<compile_context>
chip_gen: v7x
topology: tpu7x:2x2x1
jax: 0.10.0
libtpu: 0.0.40
codegen_flags: <defaults>
</compile_context>

<pallas_src>
import functools
import math

import jax
import jax.numpy as jnp
import numpy as np
from jax.experimental import pallas as pl
from jax.experimental.pallas import tpu as pltpu

LEAKY_ALPHA = 0.2
NEG_BIG = -1e9          # additive mask value for non-edges (underflows exp to 0)


def _default_logit_dtype(compute_dtype):
    """bf16 logit math only where the VPU executes packed bf16 (v6e / v7x)."""
    if jnp.dtype(compute_dtype) != jnp.dtype(jnp.bfloat16):
        return jnp.float32
    try:
        kind = jax.devices()[0].device_kind.lower()
    except Exception:
        return jnp.float32
    return jnp.bfloat16 if ("v6" in kind or "v7" in kind) else jnp.float32


def _pick_tile_m(n_nodes):
    """Destination-row tile default.

    >= 2 tiles (even count preferred) so the "parallel" grid axis can shard
    across both v7x TensorCores; capped at 128 rows so the (tile_m, N) bias /
    logit working set stays inside v7x's 64 MiB VMEM at large N.
    """
    if n_nodes < 64:
        return n_nodes
    cap = min(128, n_nodes // 2)
    best_any = None
    for d in range(cap, 7, -1):
        if n_nodes % d or d % 8:
            continue
        if best_any is None:
            best_any = d
        if (n_nodes // d) % 2 == 0:
            return d                      # even tile count: no 2:1 core imbalance
    return best_any if best_any is not None else n_nodes


# ------------------------- kernel A: fused projection -------------------------
def _project_kernel(h_ref, w_ref, ft_ref, a12_ref, *, a_cols):
    """One fused MXU matmul per row tile: [a1|a2|pad , ft_all] = h @ W_fused.

    h_ref:   (TM, F_in)            node features (compute dtype)
    w_ref:   (F_in, a_cols + H*D)  [A_l|A_r|0-pad | W_all] fused operand
    ft_ref:  (TM, H*D)             projected features (compute dtype)
    a12_ref: (TM, a_cols)          lane-dense padded [a1|a2] slab (f32)
    """
    full = jnp.dot(h_ref[...], w_ref[...], preferred_element_type=jnp.float32)
    a12_ref[...] = full[:, :a_cols]                      # lane-aligned at 0
    ft_ref[...] = full[:, a_cols:].astype(ft_ref.dtype)  # lane-aligned at 128


# ------------------- kernel B: edge softmax + message passing -----------------
def _attention_kernel(ft_ref, a1t_ref, a2_ref, mask_ref, out_ref, *,
                      num_heads, head_dim, logit_dtype, approx_recip):
    """One destination-row tile, all heads (static loop, H is small).

    ft_ref:   (N, H*D)   projected features of ALL source nodes (compute dtype)
    a1t_ref:  (H, N)     source attention term a1, lane-dense rows (f32)
    a2_ref:   (TM, H)    destination attention term a2 for this tile (f32)
    mask_ref: (TM, N)    int8 adjacency {0,1} [dst, src] for this tile
    out_ref:  (TM, H*D)  aggregated output slab for this tile
    """
    ft_all = ft_ref[...]                                    # (N, H*D)
    a1t = a1t_ref[...].astype(logit_dtype)                  # (H, N)
    a2 = a2_ref[...].astype(logit_dtype)                    # (TM, H)

    zero = jnp.asarray(0.0, logit_dtype)
    neg = jnp.asarray(NEG_BIG, logit_dtype)
    alpha = jnp.asarray(LEAKY_ALPHA, logit_dtype)

    # Expand the compact int8 adjacency to the additive bias ONCE per tile
    # (amortized over the H heads): 0 on edges, -1e9 on non-edges.
    edge = mask_ref[...].astype(logit_dtype)                # (TM, N)
    bias = jnp.where(edge > zero, zero, neg)

    outs = []
    for h in range(num_heads):
        # e[dst, src] = leaky_relu(a1[src] + a2[dst]) + bias[dst, src]
        e = a2[:, h:h + 1] + a1t[h:h + 1, :]                # (TM, N), logit dtype
        e = jnp.maximum(e, alpha * e)                       # leaky-ReLU: one vmax
        e = (e + bias).astype(jnp.float32)                  # softmax math in f32
        # edge softmax over incoming edges (per destination row)
        m = jnp.max(e, axis=-1, keepdims=True)
        p = jnp.exp(e - m)                                  # non-edges -> exactly 0
        inv = pl.reciprocal(jnp.sum(p, axis=-1, keepdims=True), approx=approx_recip)
        # message passing: out[dst] = (p @ ft_h) * (1/denom)
        ft_h = ft_all[:, h * head_dim:(h + 1) * head_dim]   # (N, D)
        acc = jnp.dot(p.astype(ft_h.dtype), ft_h,
                      preferred_element_type=jnp.float32)   # (TM, D)
        outs.append(acc * inv)

    out = outs[0] if num_heads == 1 else jnp.concatenate(outs, axis=-1)
    out_ref[...] = out.astype(out_ref.dtype)


# ------------------------------- layer wrapper --------------------------------
def gat_layer(h, adj_mask, W, attn_l, attn_r, *, tile_m=None,
              compute_dtype=jnp.bfloat16, logit_dtype=None, out_dtype=None):
    """One GAT layer. Returns a lane-dense (N, H*D) slab.

    adj_mask: (N, N) int8 [dst, src], 1 where an edge exists (self-loops assumed).
    slab.reshape(N, H, D) equals the PyTorch GATLayer output (head-major).
    """
    N, F_in = h.shape
    H, _, D = W.shape
    HD = H * D
    if out_dtype is None:
        out_dtype = compute_dtype
    if logit_dtype is None:
        logit_dtype = _default_logit_dtype(compute_dtype)
    approx_recip = jnp.dtype(compute_dtype) == jnp.dtype(jnp.bfloat16)

    if tile_m is None:
        tile_m = _pick_tile_m(N)
    tile_m = min(tile_m, N)
    if N % tile_m != 0:
        # TODO(synk): no padding path for ragged N; require an exact tiling.
        raise ValueError(f"N={N} must be divisible by tile_m={tile_m}")
    n_tiles = N // tile_m
    cd_bytes = jnp.dtype(compute_dtype).itemsize
    out_bytes = jnp.dtype(out_dtype).itemsize

    # head-major packing: column h*D + d of W_all is W[h, :, d]  (matches PyTorch
    # fc(h).reshape(N, H, D)).  attn_l / attn_r are folded into the SAME matmul:
    # a1 = h @ (W_h @ attn_l_h), a2 = h @ (W_h @ attn_r_h); the a12 columns come
    # first and are padded to 128 lanes so both output slices are lane-aligned.
    a_cols = ((2 * H + 127) // 128) * 128
    A_l = jnp.einsum('hfd,hd->fh', W, attn_l[:, 0, :])
    A_r = jnp.einsum('hfd,hd->fh', W, attn_r[:, 0, :])
    A_lr = jnp.zeros((F_in, a_cols), jnp.float32)
    A_lr = A_lr.at[:, :H].set(A_l).at[:, H:2 * H].set(A_r)
    W_all = jnp.transpose(W, (1, 0, 2)).reshape(F_in, HD)
    W_fused = jnp.concatenate([A_lr, W_all], axis=1).astype(compute_dtype)
    h_c = h.astype(compute_dtype)

    proj_cost = pl.CostEstimate(
        flops=2 * N * F_in * (a_cols + HD),
        transcendentals=0,
        bytes_accessed=(N * F_in + F_in * (a_cols + HD) + N * HD) * cd_bytes
                       + N * a_cols * 4)
    ft_all, a12 = pl.pallas_call(
        functools.partial(_project_kernel, a_cols=a_cols),
        out_shape=(jax.ShapeDtypeStruct((N, HD), compute_dtype),
                   jax.ShapeDtypeStruct((N, a_cols), jnp.float32)),
        grid=(n_tiles,),
        in_specs=[pl.BlockSpec((tile_m, F_in), lambda i: (i, 0)),
                  pl.BlockSpec((F_in, a_cols + HD), lambda i: (0, 0))],
        out_specs=(pl.BlockSpec((tile_m, HD), lambda i: (i, 0)),
                   pl.BlockSpec((tile_m, a_cols), lambda i: (i, 0))),
        compiler_params=pltpu.CompilerParams(
            dimension_semantics=("parallel",)),
        cost_estimate=proj_cost,
    )(h_c, W_fused)

    a1_t = a12[:, :H].T                   # (H, N): source term, lane-dense rows
    a2 = a12[:, H:2 * H]                  # (N, H): destination term

    # explicit VMEM budget: double-buffered operands + live f32 logit/prob
    # intermediates, with headroom (review item: make the tile math auditable).
    ldt_bytes = jnp.dtype(logit_dtype).itemsize
    vmem_working = (
        2 * N * HD * cd_bytes             # ft (grid-invariant, still 2x-buffered)
        + 2 * H * N * 4                   # a1^T
        + 2 * tile_m * H * 4              # a2 tiles
        + 2 * tile_m * N * 1              # int8 mask tiles
        + 2 * tile_m * HD * out_bytes     # output tiles
        + tile_m * N * (ldt_bytes + 2 * 4)  # bias + e/p f32 intermediates
        + tile_m * HD * 4)                # f32 accumulator
    vmem_limit = min(max(int(1.25 * vmem_working) + (2 << 20), 32 << 20), 96 << 20)

    attn_cost = pl.CostEstimate(
        flops=2 * N * N * HD + 7 * N * N * H,
        transcendentals=N * N * H,
        bytes_accessed=N * HD * cd_bytes + H * N * 4 + N * H * 4
                       + N * N * 1 + N * HD * out_bytes)
    # TODO(synk): mark ft / a1t with pipeline_mode=pl.Buffered(1) (grid-invariant,
    # no need for double buffers) and add flash-style source tiling (online
    # softmax; source axis last, "arbitrary") once (tile_m, N) tiles + the full
    # (N, H*D) ft stop fitting VMEM (v7x: 64 MiB).
    out = pl.pallas_call(
        functools.partial(_attention_kernel, num_heads=H, head_dim=D,
                          logit_dtype=logit_dtype, approx_recip=approx_recip),
        out_shape=jax.ShapeDtypeStruct((N, HD), out_dtype),
        grid=(n_tiles,),
        in_specs=[pl.BlockSpec((N, HD), lambda i: (0, 0)),       # ft, all sources
                  pl.BlockSpec((H, N), lambda i: (0, 0)),        # a1^T, all sources
                  pl.BlockSpec((tile_m, H), lambda i: (i, 0)),   # a2, dst tile
                  pl.BlockSpec((tile_m, N), lambda i: (i, 0))],  # int8 mask, dst tile
        out_specs=pl.BlockSpec((tile_m, HD), lambda i: (i, 0)),
        compiler_params=pltpu.CompilerParams(
            dimension_semantics=("parallel",),
            vmem_limit_bytes=vmem_limit),
        cost_estimate=attn_cost,
    )(ft_all, a1_t, a2, adj_mask)
    return out                                                   # (N, H*D)


# --------------------------- pure-JAX reference layer -------------------------
def gat_layer_ref(h, adj_mask, W, attn_l, attn_r):
    N = h.shape[0]
    H, _, D = W.shape
    ft = jnp.einsum('nf,hfd->nhd', h, W)                         # (N, H, D)
    a1 = jnp.einsum('nhd,hd->nh', ft, attn_l[:, 0, :])           # per src
    a2 = jnp.einsum('nhd,hd->nh', ft, attn_r[:, 0, :])           # per dst
    e = a2[:, None, :] + a1[None, :, :]                          # (dst, src, H)
    e = jnp.where(e > 0, e, LEAKY_ALPHA * e)
    e = jnp.where(adj_mask[:, :, None] > 0, e, -1e30)
    e = e - jnp.max(e, axis=1, keepdims=True)
    p = jnp.exp(e)
    attn = p / jnp.sum(p, axis=1, keepdims=True)                 # (dst, src, H)
    out = jnp.einsum('dsh,shk->dhk', attn, ft)                   # (N, H, D)
    return out.reshape(N, H * D)


# ------------------------------- full GAT forward -----------------------------
def gat_forward(params, adj_t, features, layer_fn=gat_layer,
                activation=jax.nn.elu):
    # adjacency compacted to int8 ONCE and reused by every layer (hoisted out of
    # the per-layer path: no per-layer N^2 rebuild; 1 B/entry HBM stream).
    adj_mask = (adj_t > 0).astype(jnp.int8)                      # [dst, src]
    h = features
    for p in params[:-1]:
        h = activation(layer_fn(h, adj_mask, p['W'], p['attn_l'], p['attn_r']))
    p = params[-1]
    out = layer_fn(h, adj_mask, p['W'], p['attn_l'], p['attn_r'])  # (N, H*D)
    H, _, D = p['W'].shape
    return out.reshape(out.shape[0], H, D).astype(jnp.float32).mean(axis=1)


def xavier_normal(key, shape, fan_in, fan_out, gain=1.414):
    std = gain * math.sqrt(2.0 / (fan_in + fan_out))
    return std * jax.random.normal(key, shape, dtype=jnp.float32)


if __name__ == "__main__":
    key = jax.random.PRNGKey(0)
    N = 128                     # number of graph nodes (multiple of 128 -> full lanes)
    in_dim, hidden_dim, out_dim = 32, 32, 16
    num_layers = 2
    heads = [4, 4, 2]           # len = num_layers + 1 ; H*D = 128/128/32 lanes

    k_feat, k_adj, k_p = jax.random.split(key, 3)
    features = jax.random.normal(k_feat, (N, in_dim), dtype=jnp.float32)

    # random directed graph with self-loops; adj[src, dst] = 1.0 if edge exists
    adj = (jax.random.uniform(k_adj, (N, N)) < 0.1).astype(jnp.float32)
    adj = jnp.maximum(adj, jnp.eye(N, dtype=jnp.float32))
    adj_t = adj.T               # [dst, src]

    # layer configurations mirroring GAT.__init__
    layer_cfg = [(in_dim, hidden_dim, heads[0])]
    prev = hidden_dim * heads[0]
    for l in range(1, num_layers):
        layer_cfg.append((prev, hidden_dim, heads[l]))
        prev = hidden_dim * heads[l]
    layer_cfg.append((prev, out_dim, heads[-1]))

    params = []
    kp = k_p
    for (fi, fo, H) in layer_cfg:
        kp, kw, kl, kr = jax.random.split(kp, 4)
        params.append(dict(
            W=xavier_normal(kw, (H, fi, fo), fan_in=fi, fan_out=H * fo),
            attn_l=xavier_normal(kl, (H, 1, fo), fan_in=H * fo, fan_out=fo),
            attn_r=xavier_normal(kr, (H, 1, fo), fan_in=H * fo, fan_out=fo),
        ))

    ref = gat_forward(params, adj_t, features, layer_fn=gat_layer_ref)

    # bf16-MXU path (recommended config): default tile_m picker -> 2 dst tiles.
    layer_bf16 = functools.partial(gat_layer, compute_dtype=jnp.bfloat16)
    out = jax.block_until_ready(
        gat_forward(params, adj_t, features, layer_fn=layer_bf16))
    assert out.shape == (N, out_dim)
    # bf16 matmuls + (on v6e/v7x) bf16 logit math + bf16 inter-layer slabs:
    # a couple of percent relative error vs the f32 XLA reference.
    np.testing.assert_allclose(np.asarray(out), np.asarray(ref),
                               rtol=6e-2, atol=6e-2)

    # f32 path for structural validation (f32 logits, exact reciprocal, f32 out).
    layer_f32 = functools.partial(gat_layer, compute_dtype=jnp.float32)
    out_f32 = jax.block_until_ready(
        gat_forward(params, adj_t, features, layer_fn=layer_f32))
    np.testing.assert_allclose(np.asarray(out_f32), np.asarray(ref),
                               rtol=2e-2, atol=2e-2)

    print("KERNEL_OK")
</pallas_src>

<mosaic_0001>
module attributes {stable_mosaic.version = 11 : i64} {
  func.func @_project_kernel(%arg0: i32, %arg1: memref<64x32xbf16, #tpu.memory_space<vmem>>, %arg2: memref<32x256xbf16, #tpu.memory_space<vmem>>, %arg3: memref<64x128xbf16, #tpu.memory_space<vmem>>, %arg4: memref<64x128xf32, #tpu.memory_space<vmem>>) attributes {dimension_semantics = [#tpu.dimension_semantics<parallel>], iteration_bounds = array<i64: 2>, scalar_prefetch = 0 : i64, scratch_operands = 0 : i64, tpu.core_type = #tpu.core_type<tc>, window_params = [{transform_indices = @transform_0, window_bounds = array<i64: 64, 32>}, {pipeline_mode = #tpu.pipeline_mode<synchronous>, transform_indices = @transform_1, window_bounds = array<i64: 32, 256>}, {transform_indices = @transform_2, window_bounds = array<i64: 64, 128>}, {transform_indices = @transform_3, window_bounds = array<i64: 64, 128>}]} {
    %c0 = arith.constant 0 : index
    %c0_0 = arith.constant 0 : index
    %0 = vector.load %arg1[%c0, %c0_0] : memref<64x32xbf16, #tpu.memory_space<vmem>>, vector<64x32xbf16>
    %c0_1 = arith.constant 0 : index
    %c0_2 = arith.constant 0 : index
    %1 = vector.load %arg2[%c0_1, %c0_2] : memref<32x256xbf16, #tpu.memory_space<vmem>>, vector<32x256xbf16>
    %cst = arith.constant dense<0.000000e+00> : vector<64x256xf32>
    %2 = tpu.matmul %0, %1, %cst {dimension_numbers = #tpu.dot_dimension_numbers<[1], [0], [0], [1], [0, 0, 1, 1], [], []>} : vector<64x32xbf16>, vector<32x256xbf16>, vector<64x256xf32> -> vector<64x256xf32>
    %3 = vector.extract_strided_slice %2 {offsets = [0, 0], sizes = [64, 128], strides = [1, 1]} : vector<64x256xf32> to vector<64x128xf32>
    %c0_3 = arith.constant 0 : index
    %c0_4 = arith.constant 0 : index
    %4 = vector.load %arg4[%c0_3, %c0_4] : memref<64x128xf32, #tpu.memory_space<vmem>>, vector<64x128xf32>
    tpu.vector_store %arg4[%c0_3, %c0_4], %3 {strides = array<i32>} : memref<64x128xf32, #tpu.memory_space<vmem>>, vector<64x128xf32>,
    %5 = vector.extract_strided_slice %2 {offsets = [0, 128], sizes = [64, 128], strides = [1, 1]} : vector<64x256xf32> to vector<64x128xf32>
    %6 = arith.truncf %5 : vector<64x128xf32> to vector<64x128xbf16>
    %c0_5 = arith.constant 0 : index
    %c0_6 = arith.constant 0 : index
    %7 = vector.load %arg3[%c0_5, %c0_6] : memref<64x128xbf16, #tpu.memory_space<vmem>>, vector<64x128xbf16>
    tpu.vector_store %arg3[%c0_5, %c0_6], %6 {strides = array<i32>} : memref<64x128xbf16, #tpu.memory_space<vmem>>, vector<64x128xbf16>,
    return
  }
  func.func @transform_0(%arg0: i32) -> (i32, i32) {
    %c0_i32 = arith.constant 0 : i32
    %c0_i32_0 = arith.constant 0 : i32
    return %arg0, %c0_i32 : i32, i32
  }
  func.func @transform_1(%arg0: i32) -> (i32, i32) {
    %c0_i32 = arith.constant 0 : i32
    %c0_i32_0 = arith.constant 0 : i32
    %c0_i32_1 = arith.constant 0 : i32
    return %c0_i32, %c0_i32_0 : i32, i32
  }
  func.func @transform_2(%arg0: i32) -> (i32, i32) {
    %c0_i32 = arith.constant 0 : i32
    %c0_i32_0 = arith.constant 0 : i32
    return %arg0, %c0_i32 : i32, i32
  }
  func.func @transform_3(%arg0: i32) -> (i32, i32) {
    %c0_i32 = arith.constant 0 : i32
    %c0_i32_0 = arith.constant 0 : i32
    return %arg0, %c0_i32 : i32, i32
  }
}

</mosaic_0001>

<bundles_post_ra>
// kernel: tpu_custom_call.1
= control target key start
LH: loop header
LB: loop body
LE: loop exit
PB: predicated region body
PF: predicated region fallthrough
CT: control target
= control target key end

     0   :  { %9 = vsyncpa [#allocation3], 0  ;;  %s923_s0 = inlined_call_operand.vmem [shape: bf16[128,32], index: 0, kind: input, shape index: {}]   ;;  %s924_s1 = inlined_call_operand.vmem [shape: bf16[32,256], index: 1, kind: input, shape index: {}]   ;;  %s925_s2 = inlined_call_operand.hbm [shape: bf16[128,128], index: 2, kind: output, shape index: {0}]   ;;  %s926_s3 = inlined_call_operand.hbm [shape: f32[128,128], index: 3, kind: output, shape index: {1}]  }
   0x1   :  { %11 = vsyncpa [#allocation3 + $0x1], 0 }
   0x2   :  { %12 = vsyncpa [#allocation5], 0 }
   0x3   :  { %14 = vsyncpa [#allocation5 + $0x1], 0  ;;  %s755_s12 = smov 0   ;;  %s757_s13 = smov 0  }
   0x4   :  { %s759_s14 = smov 0   ;;  %s761_s15 = smov 0  }
   0x5 LB: > { %s776_s16 = sadd.s32 4294967295, %s726_s15   ;;  %s500_s17 = sadd.s32 4294967294, %s726_s15   ;;  %s726_s15 = sphi %s761_s15, %s932_s15   ;;  %s722_s14 = sphi %s759_s14, %s931_s14   ;;  %s718_s13 = sphi %s757_s13, %s930_s13   ;;  %s714_s12 = sphi %s755_s12, %s929_s12  }
   0x6   : > { %s780_s18 = sadd.s32 1, %s726_s15   ;;  %s74_s19 = sadd.s32 1, %s722_s14 }
   0x7   : > { %s71_s20 = ssub.s32 %s726_s15, %s780_s18  ;;  %p84_p0 = scmp.ne.s32.totalorder %s722_s14, %s718_s13 }
   0x8   : > { %p72_p1 = scmp.eq.s32.totalorder %s71_s20, 0  ;;  %p85_p2 = scmp.eq.s32.totalorder %s776_s16, 1 }
   0x9   : > { %p90_p3 = scmp.ne.s32.totalorder %s718_s13, %s714_s12  ;;  %p91_p4 = scmp.eq.s32.totalorder %s500_s17, 1 }
   0xa   : > { %s791_s21 = scalar_select %p72_p1, %s722_s14, %s74_s19  }
   0xb   : > { %p793_p5 = por %p85_p2, %p84_p0  ;;  %p797_p6 = por %p91_p4, %p90_p3 }
   0xc   : > { %p503_p7 = scmp.ge.s32.totalorder %s726_s15, 1  ;;  %p147_p8 = scmp.lt.s32.totalorder %s726_s15, 3 }
   0xe   : > { %p148_p9 = pnand %p503_p7, %p147_p8 }
   0xf   : > { %v622_v0 = vld [vmem:[%s924_s1 + $0x4] ss:$8 sps:$4 sm:$0xff] (!%p148_p9)   ;;  %s506_s26 = sshll.u32 (!%p148_p9), %s776_s16, 3  ;;  %v624_v1 = vld [vmem:[%s924_s1] ss:$8 sps:$4 sm:$0xff] (!%p148_p9)   ;;  %v728_v2 = vmov (!%p148_p9), 0  }
  0x10   : > { %151 = sbr.rel (%p148_p9) target bundleno = 289 (0x121), region = 28  ;;  %282 = vmatprep.mubr.bf16.mxu0 (!%p148_p9), %v728_v2  ;;  %302 = vmatprep.mubr.bf16.mxu1 (!%p148_p9), %v728_v2  ;;  %p177_p10 = scmp.lt.s32.totalorder (!%p148_p9), %s506_s26, 15  ;;  %v625_v3 = vld [vmem:[%s924_s1 + $0x14] ss:$8 sps:$4 sm:$0xff] (!%p148_p9)   ;;  %v627_v4 = vld [vmem:[%s924_s1 + $0x10] ss:$8 sps:$4 sm:$0xff] (!%p148_p9)  }
  0x11   : > { %250 = vmatprep.subr.bf16.mxu0 (!%p148_p9), %v622_v0  ;;  %569 = vmatprep.subr.bf16.mxu1 (!%p148_p9), %v622_v0  ;;  %vm237_vm0 = vcmask (!%p148_p9), 261120   ;;  %s820_s10 = sand.u32 (!%p148_p9), 1, %s718_s13   ;;  %s544_s27 = sshll.u32 (!%p148_p9), %s776_s16, 9 }
  0x12   : > { %251 = vmatpush1.bf16.msra.mxu0 (!%p148_p9), %v624_v1  ;;  %571 = vmatpush1.bf16.msra.mxu1 (!%p148_p9), %v624_v1  ;;  %s505_s11 = sshll.u32 (!%p148_p9), %s820_s10, 6  ;;  %s504_s17 = sshll.u32 (!%p148_p9), %s820_s10, 5 }
  0x13   : > { %252 = vmatprep.subr.bf16.mxu0 (!%p148_p9), %v625_v3  ;;  %570 = vmatprep.subr.bf16.mxu1 (!%p148_p9), %v625_v3  ;;  %s824_s19 = scalar_lea.vmem (!%p148_p9), [#allocation4], %s505_s11  ;;  %s831_s24 = scalar_lea.vmem (!%p148_p9), [#allocation2], %s504_s17 }
  0x14   : > { %s406_s20 = sshll.u32 (!%p148_p9), %s824_s19, 4  ;;  %s390_s25 = sshll.u32 (!%p148_p9), %s831_s24, 4  ;;  %s837_s20 = int_to_ptr.vmem [resolvable:$true] %s406_s20  ;;  %s840_s25 = int_to_ptr.vmem [resolvable:$true] %s390_s25 }
  0x15   : > { %s852_s5 = scalar_lea.hbm (!%p148_p9), %s925_s2, %s544_s27  ;;  %s632_s7 = scalar_lea.vmem (!%p148_p9), %s837_s20, 1024 }
  0x16   : > { %253 = vmatpush1.bf16.msra.mxu0 (!%p148_p9), %v627_v4  ;;  %572 = vmatpush1.bf16.msra.mxu1 (!%p148_p9), %v627_v4  ;;  %p633_p11 = scmp.ne.s32.totalorder (!%p148_p9), %s837_s20, %s632_s7  ;;  %s729_s8 = smov (!%p148_p9), [#allocation4]  }
  0x17   : > { %s934_s26 = smov (!%p177_p10, %s506_s26), 15 }
  0x18   : > { %s507_s6 = sshll.u32 %s934_s26, 2  ;;  %s545_s26 = sshll.u32 %s776_s16, 10 }
  0x19   : > { %s180_s9 = scalar_lea.vmem %s923_s0, %s507_s6  ;;  %s845_s30 = scalar_lea.hbm %s926_s3, %s545_s26 }
  0x1a   : > { %v628_v5 = vld [vmem:[%s180_s9] sm:$0xff]   ;;  %v629_v6 = vld [vmem:[%s180_s9 + $0x10] sm:$0xff]   ;;  %v630_v7 = vld [vmem:[%s180_s9 + $0x8] sm:$0xff]   ;;  %s377_s6 = scalar_lea.sflag [#allocation5], %s820_s10  ;;  %p634_p12 = pnand %p633_p11, %p793_p5 }
  0x1b   : > { %516 = vmatmul.mubr.msk.bf16.vlgmr.msra.gmra.mrb[0].mxu0 %vm237_vm0, %v628_v5  ;;  %518 = vmatmul.mubr.msk.bf16.vlgmr.msra.gmra.mrb[0].mxu1 %vm237_vm0, %v629_v6  ;;  %v631_v8 = vld [vmem:[%s180_s9 + $0x18] sm:$0xff]   ;;  %s636_s9 = sshll.u32 %s729_s8, 4  ;;  %s637_s9 = int_to_ptr.vmem [resolvable:$false] %s636_s9 }
  0x1c   : > { %292 = vmatprep.mubr.bf16.mxu0 %v728_v2  ;;  %312 = vmatprep.mubr.bf16.mxu1 %v728_v2  ;;  %p635_p13 = pneg %p634_p12  ;;  %s638_s11 = scalar_lea.vmem %s637_s9, 2048 }
  0x1d   : > { %p639_p0 = scmp.lt.s32.totalorder %s837_s20, %s637_s9  ;;  %p640_p1 = scmp.lt.s32.totalorder %s638_s11, %s632_s7 }
  0x1f   : > { %p641_p2 = por %p640_p1, %p639_p0 }
  0x21   : > { %p642_p3 = pnand %p641_p2, %p635_p13 }
  0x23   : > { %517 = vmatmul.mubr.msk.bf16.gmra.mrb[4].mxu0 %vm237_vm0, %v630_v7  ;;  %519 = vmatmul.mubr.msk.bf16.gmra.mrb[4].mxu1 %vm237_vm0, %v631_v8 }
  0xee   : > { %v284_v9 = vpop.f32.mrb[0].mxu0  ;;  %v304_v10 = vpop.f32.mrb[0].mxu1 }
  0xef   : > { %323 = vst [vmem:[%s824_s19] sm:$0xff] %v284_v9  ;;  %327 = vst [vmem:[%s824_s19 + $0x20] sm:$0xff] %v304_v10  ;;  %v286_v11 = vpop.f32.mrb[1].mxu0  ;;  %v306_v12 = vpop.f32.mrb[1].mxu1 }
  0xf0   : > { %v288_v13 = vpop.f32.mrb[2].mxu0  ;;  %v308_v14 = vpop.f32.mrb[2].mxu1 }
  0xf1   : > { %324 = vst [vmem:[%s824_s19 + $0x8] sm:$0xff] %v288_v13  ;;  %328 = vst [vmem:[%s824_s19 + $0x28] sm:$0xff] %v308_v14  ;;  %v290_v15 = vpop.f32.mrb[3].mxu0  ;;  %v310_v16 = vpop.f32.mrb[3].mxu1 }
  0xf2   : > { %v549_v17 = vpack.c.bf16 %v290_v15, %v286_v11  ;;  %v559_v18 = vpack.c.bf16 %v310_v16, %v306_v12 }
  0xf4   : > { %550 = vst [vmem:[%s831_s24] sm:$0xff] %v549_v17   ;;  %567 = vst [vmem:[%s831_s24 + $0x10] sm:$0xff] %v559_v18  }
  0xf6   : > { %v294_v19 = vpop.f32.mrb[4].mxu0  ;;  %v314_v20 = vpop.f32.mrb[4].mxu1 }
  0xf7   : > { %325 = vst [vmem:[%s824_s19 + $0x10] sm:$0xff] %v294_v19  ;;  %329 = vst [vmem:[%s824_s19 + $0x30] sm:$0xff] %v314_v20  ;;  %v296_v21 = vpop.f32.mrb[5].mxu0  ;;  %v316_v22 = vpop.f32.mrb[5].mxu1 }
  0xf8   : > { %v298_v23 = vpop.f32.mrb[6].mxu0  ;;  %v318_v24 = vpop.f32.mrb[6].mxu1 }
  0xf9   : > { %326 = vst [vmem:[%s824_s19 + $0x18] sm:$0xff] %v298_v23  ;;  %330 = vst [vmem:[%s824_s19 + $0x38] sm:$0xff] %v318_v24  ;;  %v300_v25 = vpop.f32.mrb[7].mxu0  ;;  %v320_v26 = vpop.f32.mrb[7].mxu1 }
  0xfa   : > { %v554_v27 = vpack.c.bf16 %v300_v25, %v296_v21  ;;  %v564_v28 = vpack.c.bf16 %v320_v26, %v316_v22 }
  0xfb   : > { %645 = shalt.err (!%p642_p3)
}
  0xfc   : > { %s646_s17 = scalar_lea.hbm %s845_s30, 1024  ;;  %s650_s27 = scalar_lea.hbm %s926_s3, 2048 }
  0xfd   : > { %p647_p4 = scmp.ne.s32.totalorder %s845_s30, %s646_s17  ;;  %p651_p9 = scmp.lt.u32.totalorder %s845_s30, %s926_s3 }
  0xfe   : > { %p652_p10 = scmp.lt.u32.totalorder %s650_s27, %s646_s17  ;;  %p654_p12 = scmp.lt.u32.totalorder %s646_s17, %s845_s30 }
  0xff   : > { %p648_p7 = pnand %p647_p4, %p793_p5 }
 0x100   : > { %p653_p11 = por %p652_p10, %p651_p9 }
 0x101   : > { %p649_p8 = pneg %p648_p7 }
 0x102   : > { %p655_p13 = por %p654_p12, %p653_p11 }
 0x104   : > { %p656_p0 = pnand %p655_p13, %p649_p8 }
 0x106   : > { %659 = shalt.err (!%p656_p0)
}
 0x107   : > { %s730_s16 = smov 128   ;;  %s731_s4 = smov 8   ;;  %566 = vst [vmem:[%s831_s24 + $0x8] sm:$0xff] %v554_v27   ;;  %568 = vst [vmem:[%s831_s24 + $0x18] sm:$0xff] %v564_v28  }
 0x108   : > { %574 = dma.vmem_to_hbm [thread:$0]  (%p793_p5), %s837_s20, 1024, %s845_s30, %s377_s6, %s730_s16, %s730_s16, %s731_s4  }
 0x109   : > { %s372_s7 = scalar_lea.sflag [#allocation3], %s820_s10  ;;  %s660_s8 = scalar_lea.vmem %s840_s25, 512 }
 0x10a   : > { %p661_p1 = scmp.ne.s32.totalorder %s840_s25, %s660_s8  ;;  %s732_s9 = smov [#allocation2]  }
 0x10b   : > { %s664_s11 = sshll.u32 %s732_s9, 4  ;;  %s665_s11 = int_to_ptr.vmem [resolvable:$false] %s664_s11 }
 0x10c   : > { %p662_p2 = pnand %p661_p1, %p793_p5  ;;  %s666_s17 = scalar_lea.vmem %s665_s11, 1024 }
 0x10d   : > { %p667_p4 = scmp.lt.s32.totalorder %s840_s25, %s665_s11  ;;  %p668_p7 = scmp.lt.s32.totalorder %s666_s17, %s660_s8 }
 0x10e   : > { %p663_p3 = pneg %p662_p2 }
 0x10f   : > { %p669_p8 = por %p668_p7, %p667_p4 }
 0x111   : > { %p670_p9 = pnand %p669_p8, %p663_p3 }
 0x113   : > { %673 = shalt.err (!%p670_p9)
}
 0x114   : > { %s674_s20 = scalar_lea.hbm %s852_s5, 512  ;;  %s678_s6 = scalar_lea.hbm %s925_s2, 1024 }
 0x115   : > { %p675_p10 = scmp.ne.s32.totalorder %s852_s5, %s674_s20  ;;  %p679_p13 = scmp.lt.u32.totalorder %s852_s5, %s925_s2 }
 0x116   : > { %p680_p0 = scmp.lt.u32.totalorder %s678_s6, %s674_s20  ;;  %p682_p2 = scmp.lt.u32.totalorder %s674_s20, %s852_s5 }
 0x117   : > { %p676_p11 = pnand %p675_p10, %p793_p5 }
 0x118   : > { %p681_p1 = por %p680_p0, %p679_p13 }
 0x119   : > { %p677_p12 = pneg %p676_p11 }
 0x11a   : > { %p683_p3 = por %p682_p2, %p681_p1 }
 0x11c   : > { %p684_p4 = pnand %p683_p3, %p677_p12 }
 0x11e   : > { %687 = shalt.err (!%p684_p4)
}
 0x11f   : > { %s733_s27 = smov 64   ;;  %s734_s28 = smov 4  }
 0x120   : > { %573 = dma.vmem_to_hbm [thread:$0]  (%p793_p5), %s840_s25, 512, %s852_s5, %s372_s7, %s733_s27, %s733_s27, %s734_s28  }
 0x121 PF: > { %p584_p7 = scmp.ge.s32.totalorder %s726_s15, 2  ;;  %s421_s29 = sand.u32 1, %s714_s12  }
 0x122   : > { %s422_s16 = scalar_lea.sflag [#allocation3], %s421_s29 }
 0x123   : > { %p578_p8 = pnand %p584_p7, %p797_p6 }
 0x125   : > { %705 = dma.done.wait (!%p578_p8), %s422_s16, 512  }
 0x126   : > { %707 = vsyncadd (!%p578_p8), %s422_s16, 4294966784  ;;  %s431_s4 = scalar_lea.sflag [#allocation5], %s421_s29 }
 0x127   : > { %709 = dma.done.wait (!%p578_p8), %s431_s4, 1024  }
 0x128   : > { %711 = vsyncadd (!%p578_p8), %s431_s4, 4294966272  ;;  %p17_p5 = scmp.ge.s32.totalorder %s780_s18, 4   ;;  %s929_s12 = smov %s718_s13 }
 0x129   : > { %s930_s13 = smov %s722_s14  ;;  %s931_s14 = smov %s791_s21 }
 0x12a   : > { %s932_s15 = smov %s780_s18  ;;  %19 = sbr.rel (!%p17_p5) target bundleno = 5 (0x5), region = 80 }
 0x131   :  { %436 = vsyncpa [#allocation3], 1 }
 0x132   :  { %438 = vsyncpa [#allocation3 + $0x1], 1 }
 0x133   :  { %439 = vsyncpa [#allocation5], 1 }
 0x134   :  { %441 = vsyncpa [#allocation5 + $0x1], 1 }

</bundles_post_ra>
